<compile_context>
chip_gen: v7x
topology: tpu7x:2x2x1
jax: 0.10.0
libtpu: 0.0.40
codegen_flags: <defaults>
</compile_context>

<pallas_src>
import functools
import numpy as np
import jax
import jax.numpy as jnp
from jax.experimental import pallas as pl
from jax.experimental.pallas import tpu as pltpu


# ----------------------------------------------------------------------------
# Fused MLP kernel: refs = (x, w0, b0, w1, b1, ..., w_{L-1}, b_{L-1}, out)
# ----------------------------------------------------------------------------
def _fused_mlp_kernel(activation, num_layers, x_ref, *refs):
    o_ref = refs[-1]
    # In-kernel cast of the activation tile to bf16 for the MXU (input streams
    # from HBM as f32; no separate wrapper-side cast pass).
    h = x_ref[...].astype(jnp.bfloat16)
    for li in range(num_layers):                          # static unroll
        w_ref = refs[2 * li]
        b_ref = refs[2 * li + 1]
        # TODO(synk): training-mode dropout before each layer is omitted
        # (inference semantics: F.dropout is identity when not training).
        acc = jnp.dot(h, w_ref[...], preferred_element_type=jnp.float32)  # MXU
        acc = acc + b_ref[...]                            # f32 bias add (VPU)
        if activation:
            acc = jnp.maximum(acc, 0.0)                   # f32 ReLU (VPU)
        if li < num_layers - 1:
            h = acc.astype(jnp.bfloat16)                  # bf16 for next MXU pass
        else:
            o_ref[...] = acc.astype(o_ref.dtype)


def _round_up(n, m):
    return ((n + m - 1) // m) * m


def _pick_tm(B, block_rows):
    """Batch-row tile.

    Rules: multiples of 256 fill the v6e 256-wide MXU and amortize per-step
    overhead; >=2 grid steps for large B so the 'parallel' axis shards over
    v7x's two TensorCores; small batches get a single full-batch tile (always
    a legal block shape); odd mid-size batches round up to 16 rows for bf16
    sublane packing (Pallas masks the padded rows).
    (For very large B on v6e, block_rows=512 is the measured DMA sweet spot.)
    """
    if B > block_rows:
        return min(block_rows, max(256, _round_up(pl.cdiv(B, 2), 256)))
    if B >= 512:
        return _round_up(pl.cdiv(B, 2), 256)
    if B <= 16 or B % 16 == 0:
        return B
    return _round_up(B, 16)


# Conservative per-TC residency budget (v7x has only 64 MiB VMEM per core and
# each core holds its own weight copy when the batch axis is core-parallel).
_V7X_SAFE_RESIDENT_BYTES = 48 << 20


def mlp_forward(x, weights, biases, *, activation=True, block_rows=256,
                out_dtype=None):
    """Fused MLP forward.

    x: (B, in_dim) f32.  weights[i]: (d_i, d_{i+1}), expected pre-cast to bf16
    ONCE at init (not per call).  biases[i]: (d_{i+1},) or (1, d_{i+1}) f32.
    out_dtype defaults to x.dtype (f32); pass jnp.bfloat16 to halve the output
    writeback (the largest single HBM stream of this kernel).
    """
    num_layers = len(weights)
    B, in_dim = x.shape
    out_dim = weights[-1].shape[1]
    out_dtype = x.dtype if out_dtype is None else jnp.dtype(out_dtype)

    tm = _pick_tm(B, block_rows)
    grid = (pl.cdiv(B, tm),)

    # Biases as (1, d) rows; reshape of a 1-D vector is metadata-only.
    bs = [b if b.ndim == 2 else b.reshape(1, -1) for b in biases]

    # ---- VMEM budget --------------------------------------------------------
    weight_bytes = sum(int(np.prod(w.shape)) * w.dtype.itemsize for w in weights)
    bias_bytes = sum(int(np.prod(b.shape)) * b.dtype.itemsize for b in bs)
    resident_param_bytes = weight_bytes + bias_bytes
    if resident_param_bytes > _V7X_SAFE_RESIDENT_BYTES:
        # TODO(synk): weight-streaming fallback (extra grid axis over each
        # layer's output features, or pltpu.emit_pipeline with weights in
        # memory_space=pl.ANY) for configs exceeding v7x's 64 MiB/TC VMEM.
        raise NotImplementedError(
            "MLP parameters too large for the VMEM-resident fused kernel "
            f"({resident_param_bytes / 2**20:.1f} MiB resident).")

    max_width = max([in_dim] + [int(w.shape[1]) for w in weights])
    out_itemsize = jnp.dtype(out_dtype).itemsize
    vmem_need = (
        2 * resident_param_bytes                      # params (covers 2x buffering fallback)
        + 2 * tm * in_dim * x.dtype.itemsize          # double-buffered input tile
        + 2 * tm * out_dim * out_itemsize             # double-buffered output tile
        + tm * max_width * 6                          # f32 acc + bf16 h temporaries
    )
    vmem_limit = int(min(64 << 20, max(16 << 20, int(vmem_need * 1.5) + (1 << 20))))

    # ---- Cost estimate ------------------------------------------------------
    flops = 2 * B * sum(int(w.shape[0]) * int(w.shape[1]) for w in weights)
    bytes_accessed = (B * in_dim * x.dtype.itemsize + resident_param_bytes
                      + B * out_dim * out_itemsize)
    cost = pl.CostEstimate(flops=flops, transcendentals=0,
                           bytes_accessed=bytes_accessed)

    kernel = functools.partial(_fused_mlp_kernel, activation, num_layers)
    operands = [x]
    for w, b in zip(weights, bs):
        operands.extend([w, b])

    def _build(single_buffer_params):
        # Weight/bias blocks never change across grid steps (constant index
        # map) -> single-buffer them to halve their VMEM footprint.
        param_kwargs = (
            {"pipeline_mode": pl.Buffered(buffer_count=1)}
            if single_buffer_params else {})
        in_specs = [pl.BlockSpec((tm, in_dim), lambda i: (i, 0))]
        for w, b in zip(weights, bs):
            in_specs.append(pl.BlockSpec(w.shape, lambda i: (0, 0), **param_kwargs))
            in_specs.append(pl.BlockSpec(b.shape, lambda i: (0, 0), **param_kwargs))
        return pl.pallas_call(
            kernel,
            out_shape=jax.ShapeDtypeStruct((B, out_dim), out_dtype),
            grid=grid,
            in_specs=in_specs,
            out_specs=pl.BlockSpec((tm, out_dim), lambda i: (i, 0)),
            compiler_params=pltpu.CompilerParams(
                dimension_semantics=("parallel",),     # shards over v7x's 2 TCs
                vmem_limit_bytes=vmem_limit),
            cost_estimate=cost,
        )

    try:
        return _build(True)(*operands)
    except Exception:
        # pl.Buffered(1) unsupported on this jax/libtpu combo -> default
        # double buffering (correctness unchanged, slightly more VMEM).
        return _build(False)(*operands)


# ----------------------------------------------------------------------------
if __name__ == "__main__":
    # Module defaults: input_dim = hidden_dim = output_dim = 256, num_layers=2,
    # activation=True, dropout=0.1 (identity at inference).
    input_dim = hidden_dim = output_dim = 256
    num_layers = 2
    batch = 8

    key = jax.random.PRNGKey(0)
    keys = jax.random.split(key, 1 + 2 * num_layers)
    x = jax.random.normal(keys[0], (batch, input_dim), jnp.float32)

    dims = [input_dim] + [hidden_dim] * (num_layers - 1) + [output_dim]
    weights_f32, biases_f32 = [], []
    for li in range(num_layers):
        kw, kb = keys[1 + 2 * li], keys[2 + 2 * li]
        fan_in, fan_out = dims[li], dims[li + 1]
        w = jax.random.normal(kw, (fan_in, fan_out), jnp.float32) / np.sqrt(fan_in)
        b = 0.01 * jax.random.normal(kb, (fan_out,), jnp.float32)
        weights_f32.append(w)
        biases_f32.append(b)

    # One-time parameter prep (init-time, OUTSIDE the hot path): bf16 MXU
    # weights, (1, d) f32 biases.
    weights = [jax.device_put(w.astype(jnp.bfloat16)) for w in weights_f32]
    biases = [jax.device_put(b.reshape(1, -1)) for b in biases_f32]

    out = mlp_forward(x, weights, biases, activation=True)
    out = jax.block_until_ready(out)

    # Matched-precision pure-JAX reference (bf16 matmul operands, f32 accumulate).
    def ref_mlp(x, ws, bs):
        h = x.astype(jnp.bfloat16)
        acc = None
        for li, (w, b) in enumerate(zip(ws, bs)):
            acc = jnp.dot(h, w, preferred_element_type=jnp.float32) + b
            acc = jnp.maximum(acc, 0.0)            # module applies ReLU to every layer
            if li < len(ws) - 1:
                h = acc.astype(jnp.bfloat16)
        return acc

    expected = jax.block_until_ready(ref_mlp(x, weights, biases))

    assert out.shape == (batch, output_dim), out.shape
    assert out.dtype == jnp.float32
    assert bool(jnp.all(jnp.isfinite(out)))
    np.testing.assert_allclose(np.asarray(out), np.asarray(expected),
                               rtol=5e-2, atol=5e-2)
    print("KERNEL_OK")
</pallas_src>

<mosaic_0001>
module attributes {stable_mosaic.version = 11 : i64} {
  func.func @_fused_mlp_kernel(%arg0: i32, %arg1: memref<8x256xf32, #tpu.memory_space<vmem>>, %arg2: memref<256x256xbf16, #tpu.memory_space<vmem>>, %arg3: memref<1x256xf32, #tpu.memory_space<vmem>>, %arg4: memref<256x256xbf16, #tpu.memory_space<vmem>>, %arg5: memref<1x256xf32, #tpu.memory_space<vmem>>, %arg6: memref<8x256xf32, #tpu.memory_space<vmem>>) attributes {dimension_semantics = [#tpu.dimension_semantics<parallel>], iteration_bounds = array<i64: 1>, scalar_prefetch = 0 : i64, scratch_operands = 0 : i64, tpu.core_type = #tpu.core_type<tc>, window_params = [{transform_indices = @transform_0, window_bounds = array<i64: 8, 256>}, {pipeline_mode = #tpu.pipeline_mode<synchronous>, transform_indices = @transform_1, window_bounds = array<i64: 256, 256>}, {pipeline_mode = #tpu.pipeline_mode<synchronous>, transform_indices = @transform_2, window_bounds = array<i64: 1, 256>}, {pipeline_mode = #tpu.pipeline_mode<synchronous>, transform_indices = @transform_3, window_bounds = array<i64: 256, 256>}, {pipeline_mode = #tpu.pipeline_mode<synchronous>, transform_indices = @transform_4, window_bounds = array<i64: 1, 256>}, {transform_indices = @transform_5, window_bounds = array<i64: 8, 256>}]} {
    %c0 = arith.constant 0 : index
    %c0_0 = arith.constant 0 : index
    %0 = vector.load %arg1[%c0, %c0_0] : memref<8x256xf32, #tpu.memory_space<vmem>>, vector<8x256xf32>
    %1 = arith.truncf %0 : vector<8x256xf32> to vector<8x256xbf16>
    %c0_1 = arith.constant 0 : index
    %c0_2 = arith.constant 0 : index
    %2 = vector.load %arg2[%c0_1, %c0_2] : memref<256x256xbf16, #tpu.memory_space<vmem>>, vector<256x256xbf16>
    %cst = arith.constant dense<0.000000e+00> : vector<8x256xf32>
    %3 = tpu.matmul %1, %2, %cst {dimension_numbers = #tpu.dot_dimension_numbers<[1], [0], [0], [1], [0, 0, 1, 1], [], []>} : vector<8x256xbf16>, vector<256x256xbf16>, vector<8x256xf32> -> vector<8x256xf32>
    %c0_3 = arith.constant 0 : index
    %c0_4 = arith.constant 0 : index
    %4 = vector.load %arg3[%c0_3, %c0_4] : memref<1x256xf32, #tpu.memory_space<vmem>>, vector<1x256xf32>
    %5 = vector.broadcast %4 : vector<1x256xf32> to vector<8x256xf32>
    %6 = arith.addf %3, %5 : vector<8x256xf32>
    %cst_5 = arith.constant 0.000000e+00 : f32
    %7 = vector.broadcast %cst_5 : f32 to vector<8x256xf32>
    %8 = arith.maximumf %6, %7 : vector<8x256xf32>
    %9 = arith.truncf %8 : vector<8x256xf32> to vector<8x256xbf16>
    %c0_6 = arith.constant 0 : index
    %c0_7 = arith.constant 0 : index
    %10 = vector.load %arg4[%c0_6, %c0_7] : memref<256x256xbf16, #tpu.memory_space<vmem>>, vector<256x256xbf16>
    %cst_8 = arith.constant dense<0.000000e+00> : vector<8x256xf32>
    %11 = tpu.matmul %9, %10, %cst_8 {dimension_numbers = #tpu.dot_dimension_numbers<[1], [0], [0], [1], [0, 0, 1, 1], [], []>} : vector<8x256xbf16>, vector<256x256xbf16>, vector<8x256xf32> -> vector<8x256xf32>
    %c0_9 = arith.constant 0 : index
    %c0_10 = arith.constant 0 : index
    %12 = vector.load %arg5[%c0_9, %c0_10] : memref<1x256xf32, #tpu.memory_space<vmem>>, vector<1x256xf32>
    %13 = vector.broadcast %12 : vector<1x256xf32> to vector<8x256xf32>
    %14 = arith.addf %11, %13 : vector<8x256xf32>
    %cst_11 = arith.constant 0.000000e+00 : f32
    %15 = vector.broadcast %cst_11 : f32 to vector<8x256xf32>
    %16 = arith.maximumf %14, %15 : vector<8x256xf32>
    %c0_12 = arith.constant 0 : index
    %c0_13 = arith.constant 0 : index
    %17 = vector.load %arg6[%c0_12, %c0_13] : memref<8x256xf32, #tpu.memory_space<vmem>>, vector<8x256xf32>
    tpu.vector_store %arg6[%c0_12, %c0_13], %16 {strides = array<i32>} : memref<8x256xf32, #tpu.memory_space<vmem>>, vector<8x256xf32>,
    return
  }
  func.func @transform_0(%arg0: i32) -> (i32, i32) {
    %c0_i32 = arith.constant 0 : i32
    %c0_i32_0 = arith.constant 0 : i32
    return %arg0, %c0_i32 : i32, i32
  }
  func.func @transform_1(%arg0: i32) -> (i32, i32) {
    %c0_i32 = arith.constant 0 : i32
    %c0_i32_0 = arith.constant 0 : i32
    %c0_i32_1 = arith.constant 0 : i32
    return %c0_i32, %c0_i32_0 : i32, i32
  }
  func.func @transform_2(%arg0: i32) -> (i32, i32) {
    %c0_i32 = arith.constant 0 : i32
    %c0_i32_0 = arith.constant 0 : i32
    %c0_i32_1 = arith.constant 0 : i32
    return %c0_i32, %c0_i32_0 : i32, i32
  }
  func.func @transform_3(%arg0: i32) -> (i32, i32) {
    %c0_i32 = arith.constant 0 : i32
    %c0_i32_0 = arith.constant 0 : i32
    %c0_i32_1 = arith.constant 0 : i32
    return %c0_i32, %c0_i32_0 : i32, i32
  }
  func.func @transform_4(%arg0: i32) -> (i32, i32) {
    %c0_i32 = arith.constant 0 : i32
    %c0_i32_0 = arith.constant 0 : i32
    %c0_i32_1 = arith.constant 0 : i32
    return %c0_i32, %c0_i32_0 : i32, i32
  }
  func.func @transform_5(%arg0: i32) -> (i32, i32) {
    %c0_i32 = arith.constant 0 : i32
    %c0_i32_0 = arith.constant 0 : i32
    return %arg0, %c0_i32 : i32, i32
  }
}

module attributes {stable_mosaic.version = 11 : i64} {
  func.func @_fused_mlp_kernel(%arg0: i32, %arg1: memref<8x256xf32, #tpu.memory_space<vmem>>, %arg2: memref<256x256xbf16, #tpu.memory_space<vmem>>, %arg3: memref<1x256xf32, #tpu.memory_space<vmem>>, %arg4: memref<256x256xbf16, #tpu.memory_space<vmem>>, %arg5: memref<1x256xf32, #tpu.memory_space<vmem>>, %arg6: memref<8x256xf32, #tpu.memory_space<vmem>>) attributes {dimension_semantics = [#tpu.dimension_semantics<parallel>], iteration_bounds = array<i64: 1>, scalar_prefetch = 0 : i64, scratch_operands = 0 : i64, tpu.core_type = #tpu.core_type<tc>, window_params = [{transform_indices = @transform_0, window_bounds = array<i64: 8, 256>}, {pipeline_mode = #tpu.pipeline_mode<synchronous>, transform_indices = @transform_1, window_bounds = array<i64: 256, 256>}, {pipeline_mode = #tpu.pipeline_mode<synchronous>, transform_indices = @transform_2, window_bounds = array<i64: 1, 256>}, {pipeline_mode = #tpu.pipeline_mode<synchronous>, transform_indices = @transform_3, window_bounds = array<i64: 256, 256>}, {pipeline_mode = #tpu.pipeline_mode<synchronous>, transform_indices = @transform_4, window_bounds = array<i64: 1, 256>}, {transform_indices = @transform_5, window_bounds = array<i64: 8, 256>}]} {
    %c0 = arith.constant 0 : index
    %c0_0 = arith.constant 0 : index
    %0 = vector.load %arg1[%c0, %c0_0] : memref<8x256xf32, #tpu.memory_space<vmem>>, vector<8x256xf32>
    %1 = arith.truncf %0 : vector<8x256xf32> to vector<8x256xbf16>
    %c0_1 = arith.constant 0 : index
    %c0_2 = arith.constant 0 : index
    %2 = vector.load %arg2[%c0_1, %c0_2] : memref<256x256xbf16, #tpu.memory_space<vmem>>, vector<256x256xbf16>
    %cst = arith.constant dense<0.000000e+00> : vector<8x256xf32>
    %3 = tpu.matmul %1, %2, %cst {dimension_numbers = #tpu.dot_dimension_numbers<[1], [0], [0], [1], [0, 0, 1, 1], [], []>} : vector<8x256xbf16>, vector<256x256xbf16>, vector<8x256xf32> -> vector<8x256xf32>
    %c0_3 = arith.constant 0 : index
    %c0_4 = arith.constant 0 : index
    %4 = vector.load %arg3[%c0_3, %c0_4] : memref<1x256xf32, #tpu.memory_space<vmem>>, vector<1x256xf32>
    %5 = vector.broadcast %4 : vector<1x256xf32> to vector<8x256xf32>
    %6 = arith.addf %3, %5 : vector<8x256xf32>
    %cst_5 = arith.constant 0.000000e+00 : f32
    %7 = vector.broadcast %cst_5 : f32 to vector<8x256xf32>
    %8 = arith.maximumf %6, %7 : vector<8x256xf32>
    %9 = arith.truncf %8 : vector<8x256xf32> to vector<8x256xbf16>
    %c0_6 = arith.constant 0 : index
    %c0_7 = arith.constant 0 : index
    %10 = vector.load %arg4[%c0_6, %c0_7] : memref<256x256xbf16, #tpu.memory_space<vmem>>, vector<256x256xbf16>
    %cst_8 = arith.constant dense<0.000000e+00> : vector<8x256xf32>
    %11 = tpu.matmul %9, %10, %cst_8 {dimension_numbers = #tpu.dot_dimension_numbers<[1], [0], [0], [1], [0, 0, 1, 1], [], []>} : vector<8x256xbf16>, vector<256x256xbf16>, vector<8x256xf32> -> vector<8x256xf32>
    %c0_9 = arith.constant 0 : index
    %c0_10 = arith.constant 0 : index
    %12 = vector.load %arg5[%c0_9, %c0_10] : memref<1x256xf32, #tpu.memory_space<vmem>>, vector<1x256xf32>
    %13 = vector.broadcast %12 : vector<1x256xf32> to vector<8x256xf32>
    %14 = arith.addf %11, %13 : vector<8x256xf32>
    %cst_11 = arith.constant 0.000000e+00 : f32
    %15 = vector.broadcast %cst_11 : f32 to vector<8x256xf32>
    %16 = arith.maximumf %14, %15 : vector<8x256xf32>
    %c0_12 = arith.constant 0 : index
    %c0_13 = arith.constant 0 : index
    %17 = vector.load %arg6[%c0_12, %c0_13] : memref<8x256xf32, #tpu.memory_space<vmem>>, vector<8x256xf32>
    tpu.vector_store %arg6[%c0_12, %c0_13], %16 {strides = array<i32>} : memref<8x256xf32, #tpu.memory_space<vmem>>, vector<8x256xf32>,
    return
  }
  func.func @transform_0(%arg0: i32) -> (i32, i32) {
    %c0_i32 = arith.constant 0 : i32
    %c0_i32_0 = arith.constant 0 : i32
    return %arg0, %c0_i32 : i32, i32
  }
  func.func @transform_1(%arg0: i32) -> (i32, i32) {
    %c0_i32 = arith.constant 0 : i32
    %c0_i32_0 = arith.constant 0 : i32
    %c0_i32_1 = arith.constant 0 : i32
    return %c0_i32, %c0_i32_0 : i32, i32
  }
  func.func @transform_2(%arg0: i32) -> (i32, i32) {
    %c0_i32 = arith.constant 0 : i32
    %c0_i32_0 = arith.constant 0 : i32
    %c0_i32_1 = arith.constant 0 : i32
    return %c0_i32, %c0_i32_0 : i32, i32
  }
  func.func @transform_3(%arg0: i32) -> (i32, i32) {
    %c0_i32 = arith.constant 0 : i32
    %c0_i32_0 = arith.constant 0 : i32
    %c0_i32_1 = arith.constant 0 : i32
    return %c0_i32, %c0_i32_0 : i32, i32
  }
  func.func @transform_4(%arg0: i32) -> (i32, i32) {
    %c0_i32 = arith.constant 0 : i32
    %c0_i32_0 = arith.constant 0 : i32
    %c0_i32_1 = arith.constant 0 : i32
    return %c0_i32, %c0_i32_0 : i32, i32
  }
  func.func @transform_5(%arg0: i32) -> (i32, i32) {
    %c0_i32 = arith.constant 0 : i32
    %c0_i32_0 = arith.constant 0 : i32
    return %arg0, %c0_i32 : i32, i32
  }
}

</mosaic_0001>

<bundles_post_ra>
// kernel: tpu_custom_call.1
= control target key start
LH: loop header
LB: loop body
LE: loop exit
PB: predicated region body
PF: predicated region fallthrough
CT: control target
= control target key end

     0   :  { %10 = vsyncpa [#allocation3], 0  ;;  %s934_s0 = inlined_call_operand.hbm [shape: f32[8,256], index: 0, kind: input, shape index: {}]   ;;  %s935_s1 = inlined_call_operand.hbm [shape: bf16[256,256], index: 1, kind: input, shape index: {}]   ;;  %s936_s2 = inlined_call_operand.vmem [shape: f32[1,256], index: 2, kind: input, shape index: {}]   ;;  %s937_s3 = inlined_call_operand.hbm [shape: bf16[256,256], index: 3, kind: input, shape index: {}]   ;;  %s938_s4 = inlined_call_operand.vmem [shape: f32[1,256], index: 4, kind: input, shape index: {}]   ;;  %s939_s5 = inlined_call_operand.hbm [shape: f32[8,256], index: 5, kind: output, shape index: {}]  }
   0x1   :  { %11 = vsyncpa [#allocation6], 0 }
   0x2   :  { %12 = vsyncpa [#allocation4], 0  ;;  %s838_s18 = smov [#allocation5]   ;;  %s744_s22 = scalar_lea.hbm %s935_s1, 4096 }
   0x3   :  { %s28_s19 = sshll.u32 %s838_s18, 4  ;;  %p745_p0 = scmp.ne.s32.totalorder %s935_s1, %s744_s22  ;;  %s29_s19 = int_to_ptr.vmem [resolvable:$true] %s28_s19 }
   0x4   :  { %p748_p1 = scmp.lt.u32.totalorder %s744_s22, %s935_s1 }
   0x6   :  { %p750_p2 = pnand %p748_p1, %p745_p0 }
   0x8   :  { %753 = shalt.err (!%p750_p2)
}
   0x9   :  { %s754_s27 = scalar_lea.vmem %s29_s19, 4096  ;;  %p759_p4 = scmp.lt.s32.totalorder %s29_s19, %s29_s19 }
   0xa   :  { %p755_p3 = scmp.ne.s32.totalorder %s29_s19, %s754_s27  ;;  %p760_p5 = scmp.lt.s32.totalorder %s754_s27, %s754_s27 }
   0xc   :  { %p761_p6 = por %p760_p5, %p759_p4 }
   0xe   :  { %p762_p7 = pnand %p761_p6, %p755_p3 }
  0x10   :  { %765 = shalt.err (!%p762_p7)
}
  0x11   :  { %s839_s28 = smov 128   ;;  %s840_s29 = smov 8  }
  0x12   :  { %34 = dma.hbm_to_vmem [thread:$0]  %s935_s1, 4096, %s29_s19, [#allocation6], %s839_s28, %s839_s28, %s840_s29  }
  0x13   :  { %s841_s7 = smov [#allocation2]   ;;  %s842_s9 = smov [#allocation7]  }
  0x14   :  { %s19_s8 = sshll.u32 %s841_s7, 4  ;;  %s42_s10 = sshll.u32 %s842_s9, 4  ;;  %s20_s8 = int_to_ptr.vmem [resolvable:$true] %s19_s8  ;;  %s43_s10 = int_to_ptr.vmem [resolvable:$true] %s42_s10 }
  0x15   :  { %s766_s13 = scalar_lea.hbm %s934_s0, 256 }
  0x16   :  { %p767_p8 = scmp.ne.s32.totalorder %s934_s0, %s766_s13  ;;  %p770_p9 = scmp.lt.u32.totalorder %s766_s13, %s934_s0 }
  0x18   :  { %p772_p10 = pnand %p770_p9, %p767_p8 }
  0x1a   :  { %775 = shalt.err (!%p772_p10)
}
  0x1b   :  { %s776_s1 = scalar_lea.vmem %s20_s8, 256  ;;  %p781_p12 = scmp.lt.s32.totalorder %s20_s8, %s20_s8 }
  0x1c   :  { %p777_p11 = scmp.ne.s32.totalorder %s20_s8, %s776_s1  ;;  %p782_p13 = scmp.lt.s32.totalorder %s776_s1, %s776_s1 }
  0x1e   :  { %p783_p0 = por %p782_p13, %p781_p12 }
  0x20   :  { %p784_p1 = pnand %p783_p0, %p777_p11 }
  0x22   :  { %787 = shalt.err (!%p784_p1)
}
  0x23   :  { %22 = dma.hbm_to_vmem [thread:$0]  %s934_s0, 256, %s20_s8, [#allocation3]  }
  0x24   :  { %s788_s22 = scalar_lea.hbm %s937_s3, 4096 }
  0x25   :  { %p789_p2 = scmp.ne.s32.totalorder %s937_s3, %s788_s22  ;;  %p792_p3 = scmp.lt.u32.totalorder %s788_s22, %s937_s3 }
  0x27   :  { %p794_p4 = pnand %p792_p3, %p789_p2 }
  0x29   :  { %797 = shalt.err (!%p794_p4)
}
  0x2a   :  { %s798_s27 = scalar_lea.vmem %s43_s10, 4096  ;;  %p803_p6 = scmp.lt.s32.totalorder %s43_s10, %s43_s10 }
  0x2b   :  { %p799_p5 = scmp.ne.s32.totalorder %s43_s10, %s798_s27  ;;  %p804_p7 = scmp.lt.s32.totalorder %s798_s27, %s798_s27 }
  0x2d   :  { %p805_p8 = por %p804_p7, %p803_p6 }
  0x2f   :  { %p806_p9 = pnand %p805_p8, %p799_p5 }
  0x31   :  { %809 = shalt.err (!%p806_p9)
}
  0x32   :  { %48 = dma.hbm_to_vmem [thread:$0]  %s937_s3, 4096, %s43_s10, [#allocation6], %s839_s28, %s839_s28, %s840_s29  }
  0x33   :  { %832 = dma.done.wait [#allocation3], 256  }
  0x34   :  { %833 = vsyncadd [#allocation3], 4294967040 }
  0x35   :  { %834 = dma.done.wait [#allocation6], 8192  }
  0x36   :  { %835 = vsyncadd [#allocation6], 4294959104  ;;  %v648_v0 = vld [vmem:[#allocation5 + $0x4] ss:$8 sps:$4 sm:$0xff]   ;;  %v650_v1 = vld [vmem:[#allocation5] ss:$8 sps:$4 sm:$0xff]  }
  0x37   :  { %268 = vmatprep.subr.bf16.mxu0 %v648_v0  ;;  %v651_v2 = vld [vmem:[#allocation5 + $0x14] ss:$8 sps:$4 sm:$0xff]   ;;  %v653_v3 = vld [vmem:[#allocation5 + $0x10] ss:$8 sps:$4 sm:$0xff]   ;;  %v654_v4 = vld [vmem:[#allocation5 + $0x24] ss:$8 sps:$4 sm:$0xff]  }
  0x38   :  { %269 = vmatpush1.bf16.msra.mxu0 %v650_v1  ;;  %v656_v5 = vld [vmem:[#allocation5 + $0x20] ss:$8 sps:$4 sm:$0xff]   ;;  %v657_v6 = vld [vmem:[#allocation5 + $0x34] ss:$8 sps:$4 sm:$0xff]   ;;  %v659_v7 = vld [vmem:[#allocation5 + $0x30] ss:$8 sps:$4 sm:$0xff]  }
  0x39   :  { %270 = vmatprep.subr.bf16.mxu0 %v651_v2  ;;  %v660_v8 = vld [vmem:[#allocation5 + $0x44] ss:$8 sps:$4 sm:$0xff]   ;;  %v662_v9 = vld [vmem:[#allocation5 + $0x40] ss:$8 sps:$4 sm:$0xff]   ;;  %v663_v10 = vld [vmem:[#allocation5 + $0x54] ss:$8 sps:$4 sm:$0xff]  }
  0x3a   :  { %v665_v11 = vld [vmem:[#allocation5 + $0x50] ss:$8 sps:$4 sm:$0xff]   ;;  %v666_v12 = vld [vmem:[#allocation5 + $0x64] ss:$8 sps:$4 sm:$0xff]   ;;  %v668_v13 = vld [vmem:[#allocation5 + $0x60] ss:$8 sps:$4 sm:$0xff]  }
  0x3b   :  { %v61_v14 = vld [vmem:[#allocation2 + $0x8] sm:$0xff]  ;;  %v696_v16 = vld [vmem:[#allocation7 + $0x4] ss:$8 sps:$4 sm:$0xff]   ;;  %v698_v17 = vld [vmem:[#allocation7] ss:$8 sps:$4 sm:$0xff]  }
  0x3c   :  { %271 = vmatpush1.bf16.msra.mxu0 %v653_v3  ;;  %v63_v15 = vpack.c.bf16 %v61_v14, %v61_v14  ;;  %v669_v18 = vld [vmem:[#allocation5 + $0x74] ss:$8 sps:$4 sm:$0xff]   ;;  %v671_v20 = vld [vmem:[#allocation5 + $0x70] ss:$8 sps:$4 sm:$0xff]   ;;  %517 = vmatprep.subr.bf16.mxu1 %v696_v16  ;;  %v702_v22 = vld [vmem:[#allocation7 + $0x24] ss:$8 sps:$4 sm:$0xff]  }
  0x3d   :  { %272 = vmatprep.subr.bf16.mxu0 %v654_v4  ;;  %v699_v19 = vld [vmem:[#allocation7 + $0x14] ss:$8 sps:$4 sm:$0xff]   ;;  %518 = vmatpush1.bf16.msra.mxu1 %v698_v17  ;;  %v701_v21 = vld [vmem:[#allocation7 + $0x10] ss:$8 sps:$4 sm:$0xff]   ;;  %v672_v23 = vld [vmem:[#allocation5 + $0x84] ss:$8 sps:$4 sm:$0xff]   ;;  %v98_v4 = vlaneseq }
  0x3e   :  { %300 = vmatprep.mubr.bf16.mxu0 %v63_v15  ;;  %519 = vmatprep.subr.bf16.mxu1 %v699_v19  ;;  %v674_v24 = vld [vmem:[#allocation5 + $0x80] ss:$8 sps:$4 sm:$0xff]   ;;  %v705_v26 = vld [vmem:[#allocation7 + $0x34] ss:$8 sps:$4 sm:$0xff]   ;;  %v677_v28 = vld [vmem:[#allocation5 + $0x90] ss:$8 sps:$4 sm:$0xff]  }
  0x3f   :  { %v704_v25 = vld [vmem:[#allocation7 + $0x20] ss:$8 sps:$4 sm:$0xff]   ;;  %v675_v27 = vld [vmem:[#allocation5 + $0x94] ss:$8 sps:$4 sm:$0xff]   ;;  %v707_v29 = vld [vmem:[#allocation7 + $0x30] ss:$8 sps:$4 sm:$0xff]  }
  0x40   :  { %273 = vmatpush1.bf16.msra.mxu0 %v656_v5  ;;  %v708_v30 = vld [vmem:[#allocation7 + $0x44] ss:$8 sps:$4 sm:$0xff]   ;;  %v680_v32 = vld [vmem:[#allocation5 + $0xa0] ss:$8 sps:$4 sm:$0xff]   ;;  %v711_v34 = vld [vmem:[#allocation7 + $0x54] ss:$8 sps:$4 sm:$0xff]  }
  0x41   :  { %274 = vmatprep.subr.bf16.mxu0 %v657_v6  ;;  %520 = vmatpush1.bf16.msra.mxu1 %v701_v21  ;;  %v678_v31 = vld [vmem:[#allocation5 + $0xa4] ss:$8 sps:$4 sm:$0xff]   ;;  %v710_v33 = vld [vmem:[#allocation7 + $0x40] ss:$8 sps:$4 sm:$0xff]   ;;  %v681_v35 = vld [vmem:[#allocation5 + $0xb4] ss:$8 sps:$4 sm:$0xff]  }
  0x42   :  { %521 = vmatprep.subr.bf16.mxu1 %v702_v22  ;;  %v713_v36 = vld [vmem:[#allocation7 + $0x50] ss:$8 sps:$4 sm:$0xff]   ;;  %v714_v38 = vld [vmem:[#allocation7 + $0x64] ss:$8 sps:$4 sm:$0xff]   ;;  %v716_v40 = vld [vmem:[#allocation7 + $0x60] ss:$8 sps:$4 sm:$0xff]  }
  0x43   :  { %v683_v37 = vld [vmem:[#allocation5 + $0xb0] ss:$8 sps:$4 sm:$0xff]   ;;  %v684_v39 = vld [vmem:[#allocation5 + $0xc4] ss:$8 sps:$4 sm:$0xff]   ;;  %v686_v41 = vld [vmem:[#allocation5 + $0xc0] ss:$8 sps:$4 sm:$0xff]  }
  0x44   :  { %275 = vmatpush1.bf16.msra.mxu0 %v659_v7  ;;  %v717_v42 = vld [vmem:[#allocation7 + $0x74] ss:$8 sps:$4 sm:$0xff]   ;;  %v719_v44 = vld [vmem:[#allocation7 + $0x70] ss:$8 sps:$4 sm:$0xff]   ;;  %v720_v46 = vld [vmem:[#allocation7 + $0x84] ss:$8 sps:$4 sm:$0xff]  }
  0x45   :  { %276 = vmatprep.subr.bf16.mxu0 %v660_v8  ;;  %522 = vmatpush1.bf16.msra.mxu1 %v704_v25  ;;  %v687_v43 = vld [vmem:[#allocation5 + $0xd4] ss:$8 sps:$4 sm:$0xff]   ;;  %v689_v45 = vld [vmem:[#allocation5 + $0xd0] ss:$8 sps:$4 sm:$0xff]   ;;  %v690_v47 = vld [vmem:[#allocation5 + $0xe4] ss:$8 sps:$4 sm:$0xff]  }
  0x46   :  { %523 = vmatprep.subr.bf16.mxu1 %v705_v26  ;;  %v722_v48 = vld [vmem:[#allocation7 + $0x80] ss:$8 sps:$4 sm:$0xff]   ;;  %v723_v50 = vld [vmem:[#allocation7 + $0x94] ss:$8 sps:$4 sm:$0xff]   ;;  %v725_v52 = vld [vmem:[#allocation7 + $0x90] ss:$8 sps:$4 sm:$0xff]  }
  0x47   :  { %v692_v49 = vld [vmem:[#allocation5 + $0xe0] ss:$8 sps:$4 sm:$0xff]   ;;  %v693_v51 = vld [vmem:[#allocation5 + $0xf4] ss:$8 sps:$4 sm:$0xff]   ;;  %v695_v53 = vld [vmem:[#allocation5 + $0xf0] ss:$8 sps:$4 sm:$0xff]  }
  0x48   :  { %277 = vmatpush1.bf16.msra.mxu0 %v662_v9  ;;  %v60_v54 = vld [vmem:[#allocation2] sm:$0xff]  ;;  %v726_v55 = vld [vmem:[#allocation7 + $0xa4] ss:$8 sps:$4 sm:$0xff]   ;;  %v728_v57 = vld [vmem:[#allocation7 + $0xa0] ss:$8 sps:$4 sm:$0xff]   ;;  %v99_v5 = vshrl.u32 %v98_v4, 7 }
  0x49   :  { %278 = vmatprep.subr.bf16.mxu0 %v663_v10  ;;  %524 = vmatpush1.bf16.msra.mxu1 %v707_v29  ;;  %v62_v56 = vpack.c.bf16 %v60_v54, %v60_v54  ;;  %v729_v58 = vld [vmem:[#allocation7 + $0xb4] ss:$8 sps:$4 sm:$0xff]   ;;  %v731_v59 = vld [vmem:[#allocation7 + $0xb0] ss:$8 sps:$4 sm:$0xff]   ;;  %v732_v60 = vld [vmem:[#allocation7 + $0xc4] ss:$8 sps:$4 sm:$0xff]  }
  0x4a   :  { %525 = vmatprep.subr.bf16.mxu1 %v708_v30  ;;  %v734_v61 = vld [vmem:[#allocation7 + $0xc0] ss:$8 sps:$4 sm:$0xff]   ;;  %v735_v62 = vld [vmem:[#allocation7 + $0xd4] ss:$8 sps:$4 sm:$0xff]   ;;  %v737_v63 = vld [vmem:[#allocation7 + $0xd0] ss:$8 sps:$4 sm:$0xff]  }
  0x4b   :  { %v738_v0 = vld [vmem:[#allocation7 + $0xe4] ss:$8 sps:$4 sm:$0xff]   ;;  %v740_v1 = vld [vmem:[#allocation7 + $0xe0] ss:$8 sps:$4 sm:$0xff]   ;;  %v741_v2 = vld [vmem:[#allocation7 + $0xf4] ss:$8 sps:$4 sm:$0xff]  }
  0x4c   :  { %279 = vmatpush1.bf16.msra.mxu0 %v665_v11  ;;  %v743_v3 = vld [vmem:[#allocation7 + $0xf0] ss:$8 sps:$4 sm:$0xff]   ;;  %v100_v6 = vsub.s32 0, %v99_v5  ;;  %v104_v8 = vsub.s32 1, %v99_v5 }
  0x4d   :  { %280 = vmatprep.subr.bf16.mxu0 %v666_v12  ;;  %526 = vmatpush1.bf16.msra.mxu1 %v710_v33  ;;  %v96_v7 = vld [vmem:[%s936_s2] sm:$0x3]  ;;  %s843_s2 = smov [#allocation8]  }
  0x4e   :  { %527 = vmatprep.subr.bf16.mxu1 %v711_v34  ;;  %v101_v9 = vrot.slane %v96_v7, %v100_v6  ;;  %v105_v10 = vrot.slane %v96_v7, %v104_v8  ;;  %v345_v21 = vld [vmem:[%s938_s4] sm:$0x3]  ;;  %s568_s7 = sshll.u32 %s843_s2, 4  ;;  %s569_s7 = int_to_ptr.vmem [resolvable:$true] %s568_s7 }
  0x4f   :  { %v350_v22 = vrot.slane %v345_v21, %v100_v6  ;;  %s810_s8 = scalar_lea.vmem %s569_s7, 256  ;;  %p815_p11 = scmp.lt.s32.totalorder %s569_s7, %s569_s7 }
  0x50   :  { %281 = vmatpush1.bf16.msra.mxu0 %v668_v13  ;;  %p811_p10 = scmp.ne.s32.totalorder %s569_s7, %s810_s8  ;;  %p816_p12 = scmp.lt.s32.totalorder %s810_s8, %s810_s8 }
  0x51   :  { %282 = vmatprep.subr.bf16.mxu0 %v669_v18  ;;  %528 = vmatpush1.bf16.msra.mxu1 %v713_v36 }
  0x52   :  { %529 = vmatprep.subr.bf16.mxu1 %v714_v38  ;;  %p817_p13 = por %p816_p12, %p815_p11 }
  0x54   :  { %283 = vmatpush1.bf16.msra.mxu0 %v671_v20  ;;  %p818_p0 = pnand %p817_p13, %p811_p10 }
  0x55   :  { %284 = vmatprep.subr.bf16.mxu0 %v672_v23  ;;  %530 = vmatpush1.bf16.msra.mxu1 %v716_v40  ;;  %v354_v23 = vrot.slane %v345_v21, %v104_v8 }
  0x56   :  { %531 = vmatprep.subr.bf16.mxu1 %v717_v42 }
  0x58   :  { %285 = vmatpush1.bf16.msra.mxu0 %v674_v24 }
  0x59   :  { %286 = vmatprep.subr.bf16.mxu0 %v675_v27  ;;  %532 = vmatpush1.bf16.msra.mxu1 %v719_v44 }
  0x5a   :  { %533 = vmatprep.subr.bf16.mxu1 %v720_v46 }
  0x5c   :  { %287 = vmatpush1.bf16.msra.mxu0 %v677_v28 }
  0x5d   :  { %288 = vmatprep.subr.bf16.mxu0 %v678_v31  ;;  %534 = vmatpush1.bf16.msra.mxu1 %v722_v48 }
  0x5e   :  { %535 = vmatprep.subr.bf16.mxu1 %v723_v50 }
  0x60   :  { %289 = vmatpush1.bf16.msra.mxu0 %v680_v32 }
  0x61   :  { %290 = vmatprep.subr.bf16.mxu0 %v681_v35  ;;  %536 = vmatpush1.bf16.msra.mxu1 %v725_v52 }
  0x62   :  { %537 = vmatprep.subr.bf16.mxu1 %v726_v55 }
  0x64   :  { %291 = vmatpush1.bf16.msra.mxu0 %v683_v37 }
  0x65   :  { %292 = vmatprep.subr.bf16.mxu0 %v684_v39  ;;  %538 = vmatpush1.bf16.msra.mxu1 %v728_v57 }
  0x66   :  { %539 = vmatprep.subr.bf16.mxu1 %v729_v58 }
  0x68   :  { %293 = vmatpush1.bf16.msra.mxu0 %v686_v41 }
  0x69   :  { %294 = vmatprep.subr.bf16.mxu0 %v687_v43  ;;  %540 = vmatpush1.bf16.msra.mxu1 %v731_v59 }
  0x6a   :  { %541 = vmatprep.subr.bf16.mxu1 %v732_v60 }
  0x6c   :  { %295 = vmatpush1.bf16.msra.mxu0 %v689_v45 }
  0x6d   :  { %296 = vmatprep.subr.bf16.mxu0 %v690_v47  ;;  %542 = vmatpush1.bf16.msra.mxu1 %v734_v61 }
  0x6e   :  { %543 = vmatprep.subr.bf16.mxu1 %v735_v62 }
  0x70   :  { %297 = vmatpush1.bf16.msra.mxu0 %v692_v49 }
  0x71   :  { %298 = vmatprep.subr.bf16.mxu0 %v693_v51  ;;  %544 = vmatpush1.bf16.msra.mxu1 %v737_v63 }
  0x72   :  { %545 = vmatprep.subr.bf16.mxu1 %v738_v0 }
  0x74   :  { %299 = vmatpush1.bf16.msra.mxu0 %v695_v53 }
  0x75   :  { %546 = vmatpush1.bf16.msra.mxu1 %v740_v1 }
  0x76   :  { %547 = vmatprep.subr.bf16.mxu1 %v741_v2 }
  0x77   :  { %301 = vmatmul.mubr.bf16.vlgmr.msra.gmra.mrb[0].mxu0 %v62_v56 }
  0x79   :  { %548 = vmatpush1.bf16.msra.mxu1 %v743_v3 }
 0x14a   :  { %v302_v11 = vpop.f32.mrb[0].mxu0 }
 0x14b   :  { %v303_v12 = vadd.f32 %v302_v11, %v101_v9  ;;  %v304_v13 = vpop.f32.mrb[1].mxu0 }
 0x14c   :  { %v305_v14 = vadd.f32 %v304_v13, %v105_v10  ;;  %v306_v15 = vpop.f32.mrb[2].mxu0 }
 0x14d   :  { %v309_v16 = vmax.f32 %v303_v12, 0.0  ;;  %v307_v17 = vpop.f32.mrb[3].mxu0 }
 0x14e   :  { %v310_v18 = vmax.f32 %v305_v14, 0.0 }
 0x14f   :  { %v311_v20 = vpack.c.bf16 %v309_v16, %v309_v16 }
 0x150   :  { %v312_v19 = vpack.c.bf16 %v310_v18, %v310_v18 }
 0x152   :  { %549 = vmatprep.mubr.bf16.mxu1 %v312_v19 }
 0x153   :  { %550 = vmatmul.mubr.bf16.vlgmr.msra.gmra.mrb[0].mxu1 %v311_v20 }
 0x226   :  { %v551_v24 = vpop.f32.mrb[0].mxu1 }
 0x227   :  { %v552_v25 = vadd.f32 %v551_v24, %v350_v22  ;;  %v553_v26 = vpop.f32.mrb[1].mxu1 }
 0x228   :  { %v554_v27 = vadd.f32 %v553_v26, %v354_v23  ;;  %v555_v28 = vpop.f32.mrb[2].mxu1 }
 0x229   :  { %v558_v29 = vmax.f32 %v552_v25, 0.0  ;;  %v556_v30 = vpop.f32.mrb[3].mxu1 }
 0x22a   :  { %v559_v31 = vmax.f32 %v554_v27, 0.0 }
 0x22b   :  { %560 = vst [vmem:[#allocation8] sm:$0xff] %v558_v29 }
 0x22c   :  { %561 = vst [vmem:[#allocation8 + $0x8] sm:$0xff] %v559_v31 }
 0x22d   :  { %821 = shalt.err (!%p818_p0)
}
 0x22e   :  { %s822_s10 = scalar_lea.hbm %s939_s5, 256 }
 0x22f   :  { %p823_p1 = scmp.ne.s32.totalorder %s939_s5, %s822_s10  ;;  %p826_p2 = scmp.lt.u32.totalorder %s822_s10, %s939_s5 }
 0x231   :  { %p828_p3 = pnand %p826_p2, %p823_p1 }
 0x233   :  { %831 = shalt.err (!%p828_p3)
}
 0x234   :  { %571 = dma.vmem_to_hbm [thread:$0]  %s569_s7, 256, %s939_s5, [#allocation4]  }
 0x235   :  { %836 = dma.done.wait [#allocation4], 256  }
 0x236   :  { %837 = vsyncadd [#allocation4], 4294967040 }
 0x237   :  { %575 = vsyncpa [#allocation3], 1 }
 0x238   :  { %576 = vsyncpa [#allocation6], 1 }
 0x239   :  { %577 = vsyncpa [#allocation4], 1 }

// kernel: tpu_custom_call.1
= control target key start
LH: loop header
LB: loop body
LE: loop exit
PB: predicated region body
PF: predicated region fallthrough
CT: control target
= control target key end

     0   :  { %10 = vsyncpa [#allocation3], 0  ;;  %s934_s0 = inlined_call_operand.hbm [shape: f32[8,256], index: 0, kind: input, shape index: {}]   ;;  %s935_s1 = inlined_call_operand.hbm [shape: bf16[256,256], index: 1, kind: input, shape index: {}]   ;;  %s936_s2 = inlined_call_operand.vmem [shape: f32[1,256], index: 2, kind: input, shape index: {}]   ;;  %s937_s3 = inlined_call_operand.hbm [shape: bf16[256,256], index: 3, kind: input, shape index: {}]   ;;  %s938_s4 = inlined_call_operand.vmem [shape: f32[1,256], index: 4, kind: input, shape index: {}]   ;;  %s939_s5 = inlined_call_operand.hbm [shape: f32[8,256], index: 5, kind: output, shape index: {}]  }
   0x1   :  { %11 = vsyncpa [#allocation6], 0 }
   0x2   :  { %12 = vsyncpa [#allocation4], 0  ;;  %s838_s18 = smov [#allocation5]   ;;  %s744_s22 = scalar_lea.hbm %s935_s1, 4096 }
   0x3   :  { %s28_s19 = sshll.u32 %s838_s18, 4  ;;  %p745_p0 = scmp.ne.s32.totalorder %s935_s1, %s744_s22  ;;  %s29_s19 = int_to_ptr.vmem [resolvable:$true] %s28_s19 }
   0x4   :  { %p748_p1 = scmp.lt.u32.totalorder %s744_s22, %s935_s1 }
   0x6   :  { %p750_p2 = pnand %p748_p1, %p745_p0 }
   0x8   :  { %753 = shalt.err (!%p750_p2)
}
   0x9   :  { %s754_s27 = scalar_lea.vmem %s29_s19, 4096  ;;  %p759_p4 = scmp.lt.s32.totalorder %s29_s19, %s29_s19 }
   0xa   :  { %p755_p3 = scmp.ne.s32.totalorder %s29_s19, %s754_s27  ;;  %p760_p5 = scmp.lt.s32.totalorder %s754_s27, %s754_s27 }
   0xc   :  { %p761_p6 = por %p760_p5, %p759_p4 }
   0xe   :  { %p762_p7 = pnand %p761_p6, %p755_p3 }
  0x10   :  { %765 = shalt.err (!%p762_p7)
}
  0x11   :  { %s839_s28 = smov 128   ;;  %s840_s29 = smov 8  }
  0x12   :  { %34 = dma.hbm_to_vmem [thread:$0]  %s935_s1, 4096, %s29_s19, [#allocation6], %s839_s28, %s839_s28, %s840_s29  }
  0x13   :  { %s841_s7 = smov [#allocation2]   ;;  %s842_s9 = smov [#allocation7]  }
  0x14   :  { %s19_s8 = sshll.u32 %s841_s7, 4  ;;  %s42_s10 = sshll.u32 %s842_s9, 4  ;;  %s20_s8 = int_to_ptr.vmem [resolvable:$true] %s19_s8  ;;  %s43_s10 = int_to_ptr.vmem [resolvable:$true] %s42_s10 }
  0x15   :  { %s766_s13 = scalar_lea.hbm %s934_s0, 256 }
  0x16   :  { %p767_p8 = scmp.ne.s32.totalorder %s934_s0, %s766_s13  ;;  %p770_p9 = scmp.lt.u32.totalorder %s766_s13, %s934_s0 }
  0x18   :  { %p772_p10 = pnand %p770_p9, %p767_p8 }
  0x1a   :  { %775 = shalt.err (!%p772_p10)
}
  0x1b   :  { %s776_s1 = scalar_lea.vmem %s20_s8, 256  ;;  %p781_p12 = scmp.lt.s32.totalorder %s20_s8, %s20_s8 }
  0x1c   :  { %p777_p11 = scmp.ne.s32.totalorder %s20_s8, %s776_s1  ;;  %p782_p13 = scmp.lt.s32.totalorder %s776_s1, %s776_s1 }
  0x1e   :  { %p783_p0 = por %p782_p13, %p781_p12 }
  0x20   :  { %p784_p1 = pnand %p783_p0, %p777_p11 }
  0x22   :  { %787 = shalt.err (!%p784_p1)
}
  0x23   :  { %22 = dma.hbm_to_vmem [thread:$0]  %s934_s0, 256, %s20_s8, [#allocation3]  }
  0x24   :  { %s788_s22 = scalar_lea.hbm %s937_s3, 4096 }
  0x25   :  { %p789_p2 = scmp.ne.s32.totalorder %s937_s3, %s788_s22  ;;  %p792_p3 = scmp.lt.u32.totalorder %s788_s22, %s937_s3 }
  0x27   :  { %p794_p4 = pnand %p792_p3, %p789_p2 }
  0x29   :  { %797 = shalt.err (!%p794_p4)
}
  0x2a   :  { %s798_s27 = scalar_lea.vmem %s43_s10, 4096  ;;  %p803_p6 = scmp.lt.s32.totalorder %s43_s10, %s43_s10 }
  0x2b   :  { %p799_p5 = scmp.ne.s32.totalorder %s43_s10, %s798_s27  ;;  %p804_p7 = scmp.lt.s32.totalorder %s798_s27, %s798_s27 }
  0x2d   :  { %p805_p8 = por %p804_p7, %p803_p6 }
  0x2f   :  { %p806_p9 = pnand %p805_p8, %p799_p5 }
  0x31   :  { %809 = shalt.err (!%p806_p9)
}
  0x32   :  { %48 = dma.hbm_to_vmem [thread:$0]  %s937_s3, 4096, %s43_s10, [#allocation6], %s839_s28, %s839_s28, %s840_s29  }
  0x33   :  { %832 = dma.done.wait [#allocation3], 256  }
  0x34   :  { %833 = vsyncadd [#allocation3], 4294967040 }
  0x35   :  { %834 = dma.done.wait [#allocation6], 8192  }
  0x36   :  { %835 = vsyncadd [#allocation6], 4294959104  ;;  %v648_v0 = vld [vmem:[#allocation5 + $0x4] ss:$8 sps:$4 sm:$0xff]   ;;  %v650_v1 = vld [vmem:[#allocation5] ss:$8 sps:$4 sm:$0xff]  }
  0x37   :  { %268 = vmatprep.subr.bf16.mxu0 %v648_v0  ;;  %v651_v2 = vld [vmem:[#allocation5 + $0x14] ss:$8 sps:$4 sm:$0xff]   ;;  %v653_v3 = vld [vmem:[#allocation5 + $0x10] ss:$8 sps:$4 sm:$0xff]   ;;  %v654_v4 = vld [vmem:[#allocation5 + $0x24] ss:$8 sps:$4 sm:$0xff]  }
  0x38   :  { %269 = vmatpush1.bf16.msra.mxu0 %v650_v1  ;;  %v656_v5 = vld [vmem:[#allocation5 + $0x20] ss:$8 sps:$4 sm:$0xff]   ;;  %v657_v6 = vld [vmem:[#allocation5 + $0x34] ss:$8 sps:$4 sm:$0xff]   ;;  %v659_v7 = vld [vmem:[#allocation5 + $0x30] ss:$8 sps:$4 sm:$0xff]  }
  0x39   :  { %270 = vmatprep.subr.bf16.mxu0 %v651_v2  ;;  %v660_v8 = vld [vmem:[#allocation5 + $0x44] ss:$8 sps:$4 sm:$0xff]   ;;  %v662_v9 = vld [vmem:[#allocation5 + $0x40] ss:$8 sps:$4 sm:$0xff]   ;;  %v663_v10 = vld [vmem:[#allocation5 + $0x54] ss:$8 sps:$4 sm:$0xff]  }
  0x3a   :  { %v665_v11 = vld [vmem:[#allocation5 + $0x50] ss:$8 sps:$4 sm:$0xff]   ;;  %v666_v12 = vld [vmem:[#allocation5 + $0x64] ss:$8 sps:$4 sm:$0xff]   ;;  %v668_v13 = vld [vmem:[#allocation5 + $0x60] ss:$8 sps:$4 sm:$0xff]  }
  0x3b   :  { %v61_v14 = vld [vmem:[#allocation2 + $0x8] sm:$0xff]  ;;  %v696_v16 = vld [vmem:[#allocation7 + $0x4] ss:$8 sps:$4 sm:$0xff]   ;;  %v698_v17 = vld [vmem:[#allocation7] ss:$8 sps:$4 sm:$0xff]  }
  0x3c   :  { %271 = vmatpush1.bf16.msra.mxu0 %v653_v3  ;;  %v63_v15 = vpack.c.bf16 %v61_v14, %v61_v14  ;;  %v669_v18 = vld [vmem:[#allocation5 + $0x74] ss:$8 sps:$4 sm:$0xff]   ;;  %v671_v20 = vld [vmem:[#allocation5 + $0x70] ss:$8 sps:$4 sm:$0xff]   ;;  %517 = vmatprep.subr.bf16.mxu1 %v696_v16  ;;  %v702_v22 = vld [vmem:[#allocation7 + $0x24] ss:$8 sps:$4 sm:$0xff]  }
  0x3d   :  { %272 = vmatprep.subr.bf16.mxu0 %v654_v4  ;;  %v699_v19 = vld [vmem:[#allocation7 + $0x14] ss:$8 sps:$4 sm:$0xff]   ;;  %518 = vmatpush1.bf16.msra.mxu1 %v698_v17  ;;  %v701_v21 = vld [vmem:[#allocation7 + $0x10] ss:$8 sps:$4 sm:$0xff]   ;;  %v672_v23 = vld [vmem:[#allocation5 + $0x84] ss:$8 sps:$4 sm:$0xff]   ;;  %v98_v4 = vlaneseq }
  0x3e   :  { %300 = vmatprep.mubr.bf16.mxu0 %v63_v15  ;;  %519 = vmatprep.subr.bf16.mxu1 %v699_v19  ;;  %v674_v24 = vld [vmem:[#allocation5 + $0x80] ss:$8 sps:$4 sm:$0xff]   ;;  %v705_v26 = vld [vmem:[#allocation7 + $0x34] ss:$8 sps:$4 sm:$0xff]   ;;  %v677_v28 = vld [vmem:[#allocation5 + $0x90] ss:$8 sps:$4 sm:$0xff]  }
  0x3f   :  { %v704_v25 = vld [vmem:[#allocation7 + $0x20] ss:$8 sps:$4 sm:$0xff]   ;;  %v675_v27 = vld [vmem:[#allocation5 + $0x94] ss:$8 sps:$4 sm:$0xff]   ;;  %v707_v29 = vld [vmem:[#allocation7 + $0x30] ss:$8 sps:$4 sm:$0xff]  }
  0x40   :  { %273 = vmatpush1.bf16.msra.mxu0 %v656_v5  ;;  %v708_v30 = vld [vmem:[#allocation7 + $0x44] ss:$8 sps:$4 sm:$0xff]   ;;  %v680_v32 = vld [vmem:[#allocation5 + $0xa0] ss:$8 sps:$4 sm:$0xff]   ;;  %v711_v34 = vld [vmem:[#allocation7 + $0x54] ss:$8 sps:$4 sm:$0xff]  }
  0x41   :  { %274 = vmatprep.subr.bf16.mxu0 %v657_v6  ;;  %520 = vmatpush1.bf16.msra.mxu1 %v701_v21  ;;  %v678_v31 = vld [vmem:[#allocation5 + $0xa4] ss:$8 sps:$4 sm:$0xff]   ;;  %v710_v33 = vld [vmem:[#allocation7 + $0x40] ss:$8 sps:$4 sm:$0xff]   ;;  %v681_v35 = vld [vmem:[#allocation5 + $0xb4] ss:$8 sps:$4 sm:$0xff]  }
  0x42   :  { %521 = vmatprep.subr.bf16.mxu1 %v702_v22  ;;  %v713_v36 = vld [vmem:[#allocation7 + $0x50] ss:$8 sps:$4 sm:$0xff]   ;;  %v714_v38 = vld [vmem:[#allocation7 + $0x64] ss:$8 sps:$4 sm:$0xff]   ;;  %v716_v40 = vld [vmem:[#allocation7 + $0x60] ss:$8 sps:$4 sm:$0xff]  }
  0x43   :  { %v683_v37 = vld [vmem:[#allocation5 + $0xb0] ss:$8 sps:$4 sm:$0xff]   ;;  %v684_v39 = vld [vmem:[#allocation5 + $0xc4] ss:$8 sps:$4 sm:$0xff]   ;;  %v686_v41 = vld [vmem:[#allocation5 + $0xc0] ss:$8 sps:$4 sm:$0xff]  }
  0x44   :  { %275 = vmatpush1.bf16.msra.mxu0 %v659_v7  ;;  %v717_v42 = vld [vmem:[#allocation7 + $0x74] ss:$8 sps:$4 sm:$0xff]   ;;  %v719_v44 = vld [vmem:[#allocation7 + $0x70] ss:$8 sps:$4 sm:$0xff]   ;;  %v720_v46 = vld [vmem:[#allocation7 + $0x84] ss:$8 sps:$4 sm:$0xff]  }
  0x45   :  { %276 = vmatprep.subr.bf16.mxu0 %v660_v8  ;;  %522 = vmatpush1.bf16.msra.mxu1 %v704_v25  ;;  %v687_v43 = vld [vmem:[#allocation5 + $0xd4] ss:$8 sps:$4 sm:$0xff]   ;;  %v689_v45 = vld [vmem:[#allocation5 + $0xd0] ss:$8 sps:$4 sm:$0xff]   ;;  %v690_v47 = vld [vmem:[#allocation5 + $0xe4] ss:$8 sps:$4 sm:$0xff]  }
  0x46   :  { %523 = vmatprep.subr.bf16.mxu1 %v705_v26  ;;  %v722_v48 = vld [vmem:[#allocation7 + $0x80] ss:$8 sps:$4 sm:$0xff]   ;;  %v723_v50 = vld [vmem:[#allocation7 + $0x94] ss:$8 sps:$4 sm:$0xff]   ;;  %v725_v52 = vld [vmem:[#allocation7 + $0x90] ss:$8 sps:$4 sm:$0xff]  }
  0x47   :  { %v692_v49 = vld [vmem:[#allocation5 + $0xe0] ss:$8 sps:$4 sm:$0xff]   ;;  %v693_v51 = vld [vmem:[#allocation5 + $0xf4] ss:$8 sps:$4 sm:$0xff]   ;;  %v695_v53 = vld [vmem:[#allocation5 + $0xf0] ss:$8 sps:$4 sm:$0xff]  }
  0x48   :  { %277 = vmatpush1.bf16.msra.mxu0 %v662_v9  ;;  %v60_v54 = vld [vmem:[#allocation2] sm:$0xff]  ;;  %v726_v55 = vld [vmem:[#allocation7 + $0xa4] ss:$8 sps:$4 sm:$0xff]   ;;  %v728_v57 = vld [vmem:[#allocation7 + $0xa0] ss:$8 sps:$4 sm:$0xff]   ;;  %v99_v5 = vshrl.u32 %v98_v4, 7 }
  0x49   :  { %278 = vmatprep.subr.bf16.mxu0 %v663_v10  ;;  %524 = vmatpush1.bf16.msra.mxu1 %v707_v29  ;;  %v62_v56 = vpack.c.bf16 %v60_v54, %v60_v54  ;;  %v729_v58 = vld [vmem:[#allocation7 + $0xb4] ss:$8 sps:$4 sm:$0xff]   ;;  %v731_v59 = vld [vmem:[#allocation7 + $0xb0] ss:$8 sps:$4 sm:$0xff]   ;;  %v732_v60 = vld [vmem:[#allocation7 + $0xc4] ss:$8 sps:$4 sm:$0xff]  }
  0x4a   :  { %525 = vmatprep.subr.bf16.mxu1 %v708_v30  ;;  %v734_v61 = vld [vmem:[#allocation7 + $0xc0] ss:$8 sps:$4 sm:$0xff]   ;;  %v735_v62 = vld [vmem:[#allocation7 + $0xd4] ss:$8 sps:$4 sm:$0xff]   ;;  %v737_v63 = vld [vmem:[#allocation7 + $0xd0] ss:$8 sps:$4 sm:$0xff]  }
  0x4b   :  { %v738_v0 = vld [vmem:[#allocation7 + $0xe4] ss:$8 sps:$4 sm:$0xff]   ;;  %v740_v1 = vld [vmem:[#allocation7 + $0xe0] ss:$8 sps:$4 sm:$0xff]   ;;  %v741_v2 = vld [vmem:[#allocation7 + $0xf4] ss:$8 sps:$4 sm:$0xff]  }
  0x4c   :  { %279 = vmatpush1.bf16.msra.mxu0 %v665_v11  ;;  %v743_v3 = vld [vmem:[#allocation7 + $0xf0] ss:$8 sps:$4 sm:$0xff]   ;;  %v100_v6 = vsub.s32 0, %v99_v5  ;;  %v104_v8 = vsub.s32 1, %v99_v5 }
  0x4d   :  { %280 = vmatprep.subr.bf16.mxu0 %v666_v12  ;;  %526 = vmatpush1.bf16.msra.mxu1 %v710_v33  ;;  %v96_v7 = vld [vmem:[%s936_s2] sm:$0x3]  ;;  %s843_s2 = smov [#allocation8]  }
  0x4e   :  { %527 = vmatprep.subr.bf16.mxu1 %v711_v34  ;;  %v101_v9 = vrot.slane %v96_v7, %v100_v6  ;;  %v105_v10 = vrot.slane %v96_v7, %v104_v8  ;;  %v345_v21 = vld [vmem:[%s938_s4] sm:$0x3]  ;;  %s568_s7 = sshll.u32 %s843_s2, 4  ;;  %s569_s7 = int_to_ptr.vmem [resolvable:$true] %s568_s7 }
  0x4f   :  { %v350_v22 = vrot.slane %v345_v21, %v100_v6  ;;  %s810_s8 = scalar_lea.vmem %s569_s7, 256  ;;  %p815_p11 = scmp.lt.s32.totalorder %s569_s7, %s569_s7 }
  0x50   :  { %281 = vmatpush1.bf16.msra.mxu0 %v668_v13  ;;  %p811_p10 = scmp.ne.s32.totalorder %s569_s7, %s810_s8  ;;  %p816_p12 = scmp.lt.s32.totalorder %s810_s8, %s810_s8 }
  0x51   :  { %282 = vmatprep.subr.bf16.mxu0 %v669_v18  ;;  %528 = vmatpush1.bf16.msra.mxu1 %v713_v36 }
  0x52   :  { %529 = vmatprep.subr.bf16.mxu1 %v714_v38  ;;  %p817_p13 = por %p816_p12, %p815_p11 }
  0x54   :  { %283 = vmatpush1.bf16.msra.mxu0 %v671_v20  ;;  %p818_p0 = pnand %p817_p13, %p811_p10 }
  0x55   :  { %284 = vmatprep.subr.bf16.mxu0 %v672_v23  ;;  %530 = vmatpush1.bf16.msra.mxu1 %v716_v40  ;;  %v354_v23 = vrot.slane %v345_v21, %v104_v8 }
  0x56   :  { %531 = vmatprep.subr.bf16.mxu1 %v717_v42 }
  0x58   :  { %285 = vmatpush1.bf16.msra.mxu0 %v674_v24 }
  0x59   :  { %286 = vmatprep.subr.bf16.mxu0 %v675_v27  ;;  %532 = vmatpush1.bf16.msra.mxu1 %v719_v44 }
  0x5a   :  { %533 = vmatprep.subr.bf16.mxu1 %v720_v46 }
  0x5c   :  { %287 = vmatpush1.bf16.msra.mxu0 %v677_v28 }
  0x5d   :  { %288 = vmatprep.subr.bf16.mxu0 %v678_v31  ;;  %534 = vmatpush1.bf16.msra.mxu1 %v722_v48 }
  0x5e   :  { %535 = vmatprep.subr.bf16.mxu1 %v723_v50 }
  0x60   :  { %289 = vmatpush1.bf16.msra.mxu0 %v680_v32 }
  0x61   :  { %290 = vmatprep.subr.bf16.mxu0 %v681_v35  ;;  %536 = vmatpush1.bf16.msra.mxu1 %v725_v52 }
  0x62   :  { %537 = vmatprep.subr.bf16.mxu1 %v726_v55 }
  0x64   :  { %291 = vmatpush1.bf16.msra.mxu0 %v683_v37 }
  0x65   :  { %292 = vmatprep.subr.bf16.mxu0 %v684_v39  ;;  %538 = vmatpush1.bf16.msra.mxu1 %v728_v57 }
  0x66   :  { %539 = vmatprep.subr.bf16.mxu1 %v729_v58 }
  0x68   :  { %293 = vmatpush1.bf16.msra.mxu0 %v686_v41 }
  0x69   :  { %294 = vmatprep.subr.bf16.mxu0 %v687_v43  ;;  %540 = vmatpush1.bf16.msra.mxu1 %v731_v59 }
  0x6a   :  { %541 = vmatprep.subr.bf16.mxu1 %v732_v60 }
  0x6c   :  { %295 = vmatpush1.bf16.msra.mxu0 %v689_v45 }
  0x6d   :  { %296 = vmatprep.subr.bf16.mxu0 %v690_v47  ;;  %542 = vmatpush1.bf16.msra.mxu1 %v734_v61 }
  0x6e   :  { %543 = vmatprep.subr.bf16.mxu1 %v735_v62 }
  0x70   :  { %297 = vmatpush1.bf16.msra.mxu0 %v692_v49 }
  0x71   :  { %298 = vmatprep.subr.bf16.mxu0 %v693_v51  ;;  %544 = vmatpush1.bf16.msra.mxu1 %v737_v63 }
  0x72   :  { %545 = vmatprep.subr.bf16.mxu1 %v738_v0 }
  0x74   :  { %299 = vmatpush1.bf16.msra.mxu0 %v695_v53 }
  0x75   :  { %546 = vmatpush1.bf16.msra.mxu1 %v740_v1 }
  0x76   :  { %547 = vmatprep.subr.bf16.mxu1 %v741_v2 }
  0x77   :  { %301 = vmatmul.mubr.bf16.vlgmr.msra.gmra.mrb[0].mxu0 %v62_v56 }
  0x79   :  { %548 = vmatpush1.bf16.msra.mxu1 %v743_v3 }
 0x14a   :  { %v302_v11 = vpop.f32.mrb[0].mxu0 }
 0x14b   :  { %v303_v12 = vadd.f32 %v302_v11, %v101_v9  ;;  %v304_v13 = vpop.f32.mrb[1].mxu0 }
 0x14c   :  { %v305_v14 = vadd.f32 %v304_v13, %v105_v10  ;;  %v306_v15 = vpop.f32.mrb[2].mxu0 }
 0x14d   :  { %v309_v16 = vmax.f32 %v303_v12, 0.0  ;;  %v307_v17 = vpop.f32.mrb[3].mxu0 }
 0x14e   :  { %v310_v18 = vmax.f32 %v305_v14, 0.0 }
 0x14f   :  { %v311_v20 = vpack.c.bf16 %v309_v16, %v309_v16 }
 0x150   :  { %v312_v19 = vpack.c.bf16 %v310_v18, %v310_v18 }
 0x152   :  { %549 = vmatprep.mubr.bf16.mxu1 %v312_v19 }
 0x153   :  { %550 = vmatmul.mubr.bf16.vlgmr.msra.gmra.mrb[0].mxu1 %v311_v20 }
 0x226   :  { %v551_v24 = vpop.f32.mrb[0].mxu1 }
 0x227   :  { %v552_v25 = vadd.f32 %v551_v24, %v350_v22  ;;  %v553_v26 = vpop.f32.mrb[1].mxu1 }
 0x228   :  { %v554_v27 = vadd.f32 %v553_v26, %v354_v23  ;;  %v555_v28 = vpop.f32.mrb[2].mxu1 }
 0x229   :  { %v558_v29 = vmax.f32 %v552_v25, 0.0  ;;  %v556_v30 = vpop.f32.mrb[3].mxu1 }
 0x22a   :  { %v559_v31 = vmax.f32 %v554_v27, 0.0 }
 0x22b   :  { %560 = vst [vmem:[#allocation8] sm:$0xff] %v558_v29 }
 0x22c   :  { %561 = vst [vmem:[#allocation8 + $0x8] sm:$0xff] %v559_v31 }
 0x22d   :  { %821 = shalt.err (!%p818_p0)
}
 0x22e   :  { %s822_s10 = scalar_lea.hbm %s939_s5, 256 }
 0x22f   :  { %p823_p1 = scmp.ne.s32.totalorder %s939_s5, %s822_s10  ;;  %p826_p2 = scmp.lt.u32.totalorder %s822_s10, %s939_s5 }
 0x231   :  { %p828_p3 = pnand %p826_p2, %p823_p1 }
 0x233   :  { %831 = shalt.err (!%p828_p3)
}
 0x234   :  { %571 = dma.vmem_to_hbm [thread:$0]  %s569_s7, 256, %s939_s5, [#allocation4]  }
 0x235   :  { %836 = dma.done.wait [#allocation4], 256  }
 0x236   :  { %837 = vsyncadd [#allocation4], 4294967040 }
 0x237   :  { %575 = vsyncpa [#allocation3], 1 }
 0x238   :  { %576 = vsyncpa [#allocation6], 1 }
 0x239   :  { %577 = vsyncpa [#allocation4], 1 }

</bundles_post_ra>
